<compile_context>
chip_gen: v6e
topology: v6e:2x2x1
jax: 0.10.0
libtpu: 0.0.40
codegen_flags: <defaults>
</compile_context>

<pallas_src>
import functools
import math
import warnings

import jax
import jax.numpy as jnp
from jax.experimental import pallas as pl
from jax.experimental.pallas import tpu as pltpu


# ----------------------------- numerics helpers -----------------------------

def _layer_norm(x, gamma, beta, eps=1e-12):
    mu = jnp.mean(x, axis=-1, keepdims=True)
    var = jnp.mean((x - mu) ** 2, axis=-1, keepdims=True)
    return (x - mu) * jax.lax.rsqrt(var + eps) * gamma + beta


def _gelu(x):
    # exact (erf-based) GELU, as in the original BERT ACT2FN['gelu']
    return x * 0.5 * (1.0 + jax.lax.erf(x * (1.0 / math.sqrt(2.0))))


# ----------------- single-buffered weight BlockSpec support -----------------

@functools.lru_cache(maxsize=None)
def _single_buffer_supported():
    """Probe whether pl.Buffered(1) (single-buffered constant-index inputs)
    lowers on this jax/libtpu combo.  Isolated in a tiny kernel so genuine
    errors in the real kernels are never swallowed by a fallback."""
    def _probe(w_ref, x_ref, o_ref):
        o_ref[...] = x_ref[...] + w_ref[...]

    try:
        w = jnp.zeros((8, 128), jnp.float32)
        x = jnp.zeros((16, 128), jnp.float32)
        out = pl.pallas_call(
            _probe,
            out_shape=jax.ShapeDtypeStruct((16, 128), jnp.float32),
            grid=(2,),
            in_specs=[pl.BlockSpec((8, 128), lambda i: (0, 0),
                                   pipeline_mode=pl.Buffered(1)),
                      pl.BlockSpec((8, 128), lambda i: (i, 0))],
            out_specs=pl.BlockSpec((8, 128), lambda i: (i, 0)),
        )(w, x)
        jax.block_until_ready(out)
        return True
    except Exception as e:  # depends on jax version
        warnings.warn(f"pl.Buffered(1) not supported ({e!r}); "
                      "weights will be double-buffered (VMEM budget adjusted).")
        return False


# ------------------------------- kernels -------------------------------------

def _kv_proj_kernel(h_ref, wkv_ref, bkv_ref, kT_ref, v_ref, *, num_heads, head_dim):
    """Fused K/V projection for one batch; K stored transposed per head."""
    NH, dH = num_heads, head_dim
    H = NH * dH
    S = h_ref.shape[1]
    hs = h_ref[0].astype(jnp.bfloat16)                                   # (S, H)
    kv = jnp.dot(hs, wkv_ref[...],
                 preferred_element_type=jnp.float32) + bkv_ref[...]      # (S, 2H)
    k = kv[:, :H].reshape(S, NH, dH)
    v = kv[:, H:].reshape(S, NH, dH)
    kT_ref[0] = k.transpose(1, 2, 0).astype(jnp.bfloat16)                # (NH, dH, S)
    v_ref[0] = v.transpose(1, 0, 2).astype(jnp.bfloat16)                 # (NH, S, dH)


def _bert_layer_kernel(hq_ref, mask_ref, kT_ref, v_ref,
                       wq_ref, bq_ref, wo_ref, bo_ref, g1_ref, be1_ref,
                       wi_ref, bi_ref, w2_ref, b2_ref, g2_ref, be2_ref,
                       out_ref, ctx_scr, *, num_heads, head_dim):
    NH, dH = num_heads, head_dim

    hq = hq_ref[0]                                                       # (TQ, H) f32
    mask = mask_ref[0]                                                   # (1, S) additive

    # Q projection; 1/sqrt(dH) already folded into wq/bq on the host.
    q = (jnp.dot(hq.astype(jnp.bfloat16), wq_ref[...],
                 preferred_element_type=jnp.float32) + bq_ref[...])      # (TQ, H)
    q = q.astype(jnp.bfloat16)

    # Per-head attention.  K is stored pre-transposed as (dH, S), so Q@K^T is
    # the canonical MXU [K=dH, N=S] shape; each head's P@V result is written
    # directly into its column slab of ctx_scr (no context relayout).
    for h in range(NH):
        s = jnp.dot(q[:, h * dH:(h + 1) * dH], kT_ref[0, h],
                    preferred_element_type=jnp.float32)                  # (TQ, S)
        s = s + mask
        s = s - jnp.max(s, axis=-1, keepdims=True)
        p = jnp.exp(s)
        denom = jnp.sum(p, axis=-1, keepdims=True)                       # (TQ, 1)
        ctx_h = jnp.dot(p.astype(jnp.bfloat16), v_ref[0, h],
                        preferred_element_type=jnp.float32)              # (TQ, dH)
        # deferred softmax normalization: scale the (TQ, dH) context, not the
        # (TQ, S) probabilities.  EUP reciprocal is effectively free.
        ctx_scr[:, h * dH:(h + 1) * dH] = ctx_h * pl.reciprocal(denom, approx=True)

    # ---- BertSelfOutput: dense + residual + LayerNorm ----
    attn_out = jnp.dot(ctx_scr[...].astype(jnp.bfloat16), wo_ref[...],
                       preferred_element_type=jnp.float32) + bo_ref[...]
    x1 = _layer_norm(attn_out + hq, g1_ref[...], be1_ref[...])

    # ---- BertIntermediate: dense + GELU ----
    inter = _gelu(jnp.dot(x1.astype(jnp.bfloat16), wi_ref[...],
                          preferred_element_type=jnp.float32) + bi_ref[...])

    # ---- BertOutput: dense + residual + LayerNorm ----
    out2 = jnp.dot(inter.astype(jnp.bfloat16), w2_ref[...],
                   preferred_element_type=jnp.float32) + b2_ref[...]
    out_ref[0] = _layer_norm(out2 + x1, g2_ref[...], be2_ref[...]).astype(out_ref.dtype)


# ------------------------------- wrapper --------------------------------------

def _pick_q_tile(S, H, I):
    """Largest query tile whose per-tile transients stay within a few MiB
    (keeps score/activation working set v7x-friendly) while keeping the MXU's
    M dimension filled."""
    if S <= 256:
        return S
    budget = 8 << 20
    for t in (256, 128, 64, 32, 16, 8):
        if S % t:
            continue
        transient = t * (20 * H + 8 * I + 16 * S)   # rough f32+bf16 live bytes
        if transient <= budget:
            return t
    return 8 if S % 8 == 0 else S


def bert_layer(hidden, attn_mask, params, num_heads, out_dtype=None):
    """BertLayer forward.  hidden: (B, S, H) f32; attn_mask: (B, S) additive
    mask (0 = attend, -10000 = masked), applied like torch's [B,1,1,S] mask."""
    B, S, H = hidden.shape
    I = params["wi"].shape[0]
    NH = num_heads
    dH = H // NH
    TQ = _pick_q_tile(S, H, I)
    n_q = S // TQ
    out_dtype = hidden.dtype if out_dtype is None else out_dtype
    out_itemsize = jnp.dtype(out_dtype).itemsize
    bf16 = jnp.bfloat16

    # --- host-side weight prep: (in, out) layout, bf16, scale folded into Q ---
    inv_sqrt_d = 1.0 / math.sqrt(dH)
    wqT = (params["wq"].T * inv_sqrt_d).astype(bf16)                          # (H, H)
    bq = (params["bq"] * inv_sqrt_d).astype(jnp.float32)                      # (1, H)
    wkvT = jnp.concatenate([params["wk"].T, params["wv"].T], 1).astype(bf16)  # (H, 2H)
    bkv = jnp.concatenate([params["bk"], params["bv"]], 1).astype(jnp.float32)
    woT = params["wo"].T.astype(bf16)                                         # (H, H)
    wiT = params["wi"].T.astype(bf16)                                         # (H, I)
    w2T = params["w2"].T.astype(bf16)                                         # (I, H)
    mask3 = attn_mask.reshape(B, 1, S).astype(jnp.float32)

    single = _single_buffer_supported()
    wbuf = 1 if single else 2

    def wspec(shape):
        # weight / bias / LN-param block: its block index never changes.
        idx = lambda *_: (0,) * len(shape)
        if single:
            return pl.BlockSpec(shape, idx, pipeline_mode=pl.Buffered(1))
        return pl.BlockSpec(shape, idx)

    def vmem_limit(resident_bytes):
        # explicit scoped-VMEM budget: 25% headroom + 2 MiB, clamped to
        # [16 MiB, 64 MiB] (64 MiB = v7x physical VMEM per TensorCore).
        return int(min(max(int(resident_bytes * 1.25) + (2 << 20), 16 << 20), 64 << 20))

    # ---------------------- pass 1: fused K/V projection ----------------------
    kv_resident = (wbuf * 4 * H * H            # wkvT (H, 2H) bf16
                   + wbuf * 8 * H              # bkv f32
                   + 8 * S * H                 # hidden block (f32, double-buffered)
                   + 8 * S * H                 # kT + V output blocks (bf16, dbuf)
                   + 24 * S * H)               # in-kernel transients (kv f32, relayouts)
    kv_cost = pl.CostEstimate(
        flops=4 * B * S * H * H,
        transcendentals=0,
        bytes_accessed=4 * B * S * H + 4 * H * H + 4 * B * S * H)

    kv_kernel = functools.partial(_kv_proj_kernel, num_heads=NH, head_dim=dH)
    kT, v = pl.pallas_call(
        kv_kernel,
        out_shape=(jax.ShapeDtypeStruct((B, NH, dH, S), bf16),
                   jax.ShapeDtypeStruct((B, NH, S, dH), bf16)),
        grid=(B,),
        in_specs=[pl.BlockSpec((1, S, H), lambda b: (b, 0, 0)),
                  wspec((H, 2 * H)), wspec((1, 2 * H))],
        out_specs=(pl.BlockSpec((1, NH, dH, S), lambda b: (b, 0, 0, 0)),
                   pl.BlockSpec((1, NH, S, dH), lambda b: (b, 0, 0, 0))),
        compiler_params=pltpu.CompilerParams(
            dimension_semantics=("parallel",),
            vmem_limit_bytes=vmem_limit(kv_resident)),
        cost_estimate=kv_cost,
    )(hidden, wkvT, bkv)

    # --------------------------- pass 2: main layer ---------------------------
    main_resident = (
        wbuf * 2 * (2 * H * H + 2 * H * I)     # wq, wo, wi, w2 (bf16)
        + wbuf * 4 * (8 * H + I)               # biases + LN params (f32)
        + 2 * 2 * (2 * S * H)                  # kT + V blocks (bf16, double-buffered)
        + 2 * 4 * TQ * H                       # hidden query tile (f32, dbuf)
        + 2 * out_itemsize * TQ * H            # output tile (dbuf)
        + 4 * TQ * H                           # ctx scratch (f32)
        + TQ * (20 * H + 8 * I + 16 * S))      # per-tile transients (rough)

    flops = 2 * B * S * (2 * H * H + 2 * H * I) + 4 * B * S * S * H
    transc = B * NH * S * S + B * S * I
    bytes_acc = (2 * (2 * H * H + 2 * H * I)   # bf16 matmul weights
                 + 4 * (8 * H + I)             # biases + LN params
                 + 4 * B * S * H               # hidden read (f32)
                 + out_itemsize * B * S * H    # output write
                 + 2 * 2 * B * S * H           # kT + V read (bf16)
                 + 4 * B * S)                  # mask
    main_cost = pl.CostEstimate(flops=flops, transcendentals=transc,
                                bytes_accessed=bytes_acc)

    main_kernel = functools.partial(_bert_layer_kernel, num_heads=NH, head_dim=dH)
    return pl.pallas_call(
        main_kernel,
        out_shape=jax.ShapeDtypeStruct((B, S, H), out_dtype),
        grid=(B, n_q),
        in_specs=[
            pl.BlockSpec((1, TQ, H), lambda b, qi: (b, qi, 0)),        # query tile
            pl.BlockSpec((1, 1, S), lambda b, qi: (b, 0, 0)),          # additive mask
            pl.BlockSpec((1, NH, dH, S), lambda b, qi: (b, 0, 0, 0)),  # K^T (per batch)
            pl.BlockSpec((1, NH, S, dH), lambda b, qi: (b, 0, 0, 0)),  # V   (per batch)
            wspec((H, H)), wspec((1, H)),                              # WqT, bq (scaled)
            wspec((H, H)), wspec((1, H)),                              # WoT, bo
            wspec((1, H)), wspec((1, H)),                              # LN1 gamma, beta
            wspec((H, I)), wspec((1, I)),                              # WiT, bi
            wspec((I, H)), wspec((1, H)),                              # W2T, b2
            wspec((1, H)), wspec((1, H)),                              # LN2 gamma, beta
        ],
        out_specs=pl.BlockSpec((1, TQ, H), lambda b, qi: (b, qi, 0)),
        scratch_shapes=[pltpu.VMEM((TQ, H), jnp.float32)],             # ctx columns
        compiler_params=pltpu.CompilerParams(
            # No state carried across grid steps -> both axes parallel
            # (v7x megacore sharding works even at B == 1).
            dimension_semantics=("parallel", "parallel"),
            vmem_limit_bytes=vmem_limit(main_resident)),
        cost_estimate=main_cost,
    )(hidden, mask3, kT, v,
      wqT, bq, woT, params["bo"], params["g1"], params["be1"],
      wiT, params["bi"], w2T, params["b2"], params["g2"], params["be2"])


# ------------------------- pure-JAX reference (check) ------------------------

def bert_layer_ref(hidden, attn_mask, p, num_heads):
    B, S, H = hidden.shape
    dH = H // num_heads
    lin = lambda x, w, b: x @ w.T + b[0]
    ln = lambda x, g, b: _layer_norm(x, g[0], b[0])

    q = lin(hidden, p["wq"], p["bq"]).reshape(B, S, num_heads, dH).transpose(0, 2, 1, 3)
    k = lin(hidden, p["wk"], p["bk"]).reshape(B, S, num_heads, dH).transpose(0, 2, 1, 3)
    v = lin(hidden, p["wv"], p["bv"]).reshape(B, S, num_heads, dH).transpose(0, 2, 1, 3)
    scores = jnp.einsum("bhqd,bhkd->bhqk", q, k) / math.sqrt(dH)
    scores = scores + attn_mask[:, None, None, :]
    probs = jax.nn.softmax(scores, axis=-1)
    ctx = jnp.einsum("bhqk,bhkd->bhqd", probs, v).transpose(0, 2, 1, 3).reshape(B, S, H)
    x1 = ln(lin(ctx, p["wo"], p["bo"]) + hidden, p["g1"], p["be1"])
    inter = _gelu(lin(x1, p["wi"], p["bi"]))
    return ln(lin(inter, p["w2"], p["b2"]) + x1, p["g2"], p["be2"])


# --------------------------------- main --------------------------------------

if __name__ == "__main__":
    B, S, H, NH, I = 2, 8, 32, 4, 64  # batch, seq, hidden, heads, intermediate

    key = jax.random.PRNGKey(0)
    ks = jax.random.split(key, 16)
    n = lambda k, shape: (0.02 * jax.random.normal(k, shape)).astype(jnp.float32)

    params = {
        "wq": n(ks[0], (H, H)),  "bq": n(ks[1], (1, H)),
        "wk": n(ks[2], (H, H)),  "bk": n(ks[3], (1, H)),
        "wv": n(ks[4], (H, H)),  "bv": n(ks[5], (1, H)),
        "wo": n(ks[6], (H, H)),  "bo": n(ks[7], (1, H)),
        "g1": jnp.ones((1, H), jnp.float32), "be1": jnp.zeros((1, H), jnp.float32),
        "wi": n(ks[8], (I, H)),  "bi": n(ks[9], (1, I)),
        "w2": n(ks[10], (H, I)), "b2": n(ks[11], (1, H)),
        "g2": jnp.ones((1, H), jnp.float32), "be2": jnp.zeros((1, H), jnp.float32),
    }

    hidden = jax.random.normal(ks[12], (B, S, H), dtype=jnp.float32)
    # extended additive attention mask: batch 0 fully visible, batch 1 masks last 2 tokens
    keep = jnp.ones((B, S), jnp.float32).at[1, -2:].set(0.0)
    attn_mask = (1.0 - keep) * -10000.0

    out = bert_layer(hidden, attn_mask, params, NH)
    jax.block_until_ready(out)

    ref = bert_layer_ref(hidden, attn_mask, params, NH)
    assert out.shape == (B, S, H)
    # bf16 matmul operands (f32 accumulation) + approx reciprocal -> looser tolerance
    assert jnp.allclose(out, ref, atol=2e-2, rtol=2e-2), float(jnp.max(jnp.abs(out - ref)))

    print("KERNEL_OK")
</pallas_src>

<mosaic_0001>
module attributes {stable_mosaic.version = 11 : i64} {
  func.func @_probe(%arg0: i32, %arg1: memref<8x128xf32, #tpu.memory_space<vmem>>, %arg2: memref<8x128xf32, #tpu.memory_space<vmem>>, %arg3: memref<8x128xf32, #tpu.memory_space<vmem>>) attributes {dimension_semantics = [#tpu.dimension_semantics<arbitrary>], iteration_bounds = array<i64: 2>, scalar_prefetch = 0 : i64, scratch_operands = 0 : i64, tpu.core_type = #tpu.core_type<tc>, window_params = [{pipeline_mode = #tpu.pipeline_mode<synchronous>, transform_indices = @transform_0, window_bounds = array<i64: 8, 128>}, {transform_indices = @transform_1, window_bounds = array<i64: 8, 128>}, {transform_indices = @transform_2, window_bounds = array<i64: 8, 128>}]} {
    %c0 = arith.constant 0 : index
    %c0_0 = arith.constant 0 : index
    %0 = vector.load %arg2[%c0, %c0_0] : memref<8x128xf32, #tpu.memory_space<vmem>>, vector<8x128xf32>
    %c0_1 = arith.constant 0 : index
    %c0_2 = arith.constant 0 : index
    %1 = vector.load %arg1[%c0_1, %c0_2] : memref<8x128xf32, #tpu.memory_space<vmem>>, vector<8x128xf32>
    %2 = arith.addf %0, %1 : vector<8x128xf32>
    %c0_3 = arith.constant 0 : index
    %c0_4 = arith.constant 0 : index
    %3 = vector.load %arg3[%c0_3, %c0_4] : memref<8x128xf32, #tpu.memory_space<vmem>>, vector<8x128xf32>
    tpu.vector_store %arg3[%c0_3, %c0_4], %2 {strides = array<i32>} : memref<8x128xf32, #tpu.memory_space<vmem>>, vector<8x128xf32>,
    return
  }
  func.func @transform_0(%arg0: i32) -> (i32, i32) {
    %c0_i32 = arith.constant 0 : i32
    %c0_i32_0 = arith.constant 0 : i32
    %c0_i32_1 = arith.constant 0 : i32
    return %c0_i32, %c0_i32_0 : i32, i32
  }
  func.func @transform_1(%arg0: i32) -> (i32, i32) {
    %c0_i32 = arith.constant 0 : i32
    %c0_i32_0 = arith.constant 0 : i32
    return %arg0, %c0_i32 : i32, i32
  }
  func.func @transform_2(%arg0: i32) -> (i32, i32) {
    %c0_i32 = arith.constant 0 : i32
    %c0_i32_0 = arith.constant 0 : i32
    return %arg0, %c0_i32 : i32, i32
  }
}

module attributes {stable_mosaic.version = 11 : i64} {
  func.func @_kv_proj_kernel(%arg0: i32, %arg1: memref<1x8x32xf32, #tpu.memory_space<vmem>>, %arg2: memref<32x64xbf16, #tpu.memory_space<vmem>>, %arg3: memref<1x64xf32, #tpu.memory_space<vmem>>, %arg4: memref<1x4x8x8xbf16, #tpu.memory_space<vmem>>, %arg5: memref<1x4x8x8xbf16, #tpu.memory_space<vmem>>) attributes {dimension_semantics = [#tpu.dimension_semantics<parallel>], iteration_bounds = array<i64: 2>, scalar_prefetch = 0 : i64, scratch_operands = 0 : i64, tpu.core_type = #tpu.core_type<tc>, window_params = [{transform_indices = @transform_0, window_bounds = array<i64: 1, 8, 32>}, {pipeline_mode = #tpu.pipeline_mode<synchronous>, transform_indices = @transform_1, window_bounds = array<i64: 32, 64>}, {pipeline_mode = #tpu.pipeline_mode<synchronous>, transform_indices = @transform_2, window_bounds = array<i64: 1, 64>}, {transform_indices = @transform_3, window_bounds = array<i64: 1, 4, 8, 8>}, {transform_indices = @transform_4, window_bounds = array<i64: 1, 4, 8, 8>}]} {
    %c0 = arith.constant 0 : index
    %c0_0 = arith.constant 0 : index
    %c0_1 = arith.constant 0 : index
    %0 = vector.load %arg1[%c0, %c0_0, %c0_1] : memref<1x8x32xf32, #tpu.memory_space<vmem>>, vector<1x8x32xf32>
    %1 = vector.shape_cast %0 : vector<1x8x32xf32> to vector<8x32xf32>
    %2 = arith.truncf %1 : vector<8x32xf32> to vector<8x32xbf16>
    %c0_2 = arith.constant 0 : index
    %c0_3 = arith.constant 0 : index
    %3 = vector.load %arg2[%c0_2, %c0_3] : memref<32x64xbf16, #tpu.memory_space<vmem>>, vector<32x64xbf16>
    %cst = arith.constant dense<0.000000e+00> : vector<8x64xf32>
    %4 = tpu.matmul %2, %3, %cst {dimension_numbers = #tpu.dot_dimension_numbers<[1], [0], [0], [1], [0, 0, 1, 1], [], []>} : vector<8x32xbf16>, vector<32x64xbf16>, vector<8x64xf32> -> vector<8x64xf32>
    %c0_4 = arith.constant 0 : index
    %c0_5 = arith.constant 0 : index
    %5 = vector.load %arg3[%c0_4, %c0_5] : memref<1x64xf32, #tpu.memory_space<vmem>>, vector<1x64xf32>
    %6 = vector.broadcast %5 : vector<1x64xf32> to vector<8x64xf32>
    %7 = arith.addf %4, %6 : vector<8x64xf32>
    %8 = vector.extract_strided_slice %7 {offsets = [0, 0], sizes = [8, 32], strides = [1, 1]} : vector<8x64xf32> to vector<8x32xf32>
    %9 = vector.shape_cast %8 : vector<8x32xf32> to vector<8x4x8xf32>
    %10 = vector.extract_strided_slice %7 {offsets = [0, 32], sizes = [8, 32], strides = [1, 1]} : vector<8x64xf32> to vector<8x32xf32>
    %11 = vector.shape_cast %10 : vector<8x32xf32> to vector<8x4x8xf32>
    %12 = tpu.transpose %9, [1, 2, 0] : vector<8x4x8xf32> -> vector<4x8x8xf32>
    %13 = arith.truncf %12 : vector<4x8x8xf32> to vector<4x8x8xbf16>
    %c0_6 = arith.constant 0 : index
    %c0_7 = arith.constant 0 : index
    %c0_8 = arith.constant 0 : index
    %c0_9 = arith.constant 0 : index
    %14 = vector.load %arg4[%c0_6, %c0_7, %c0_8, %c0_9] : memref<1x4x8x8xbf16, #tpu.memory_space<vmem>>, vector<1x4x8x8xbf16>
    %15 = vector.shape_cast %14 : vector<1x4x8x8xbf16> to vector<4x8x8xbf16>
    %16 = vector.shape_cast %13 : vector<4x8x8xbf16> to vector<1x4x8x8xbf16>
    tpu.vector_store %arg4[%c0_6, %c0_7, %c0_8, %c0_9], %16 {strides = array<i32>} : memref<1x4x8x8xbf16, #tpu.memory_space<vmem>>, vector<1x4x8x8xbf16>,
    %17 = tpu.transpose %11, [1, 0, 2] : vector<8x4x8xf32> -> vector<4x8x8xf32>
    %18 = arith.truncf %17 : vector<4x8x8xf32> to vector<4x8x8xbf16>
    %c0_10 = arith.constant 0 : index
    %c0_11 = arith.constant 0 : index
    %c0_12 = arith.constant 0 : index
    %c0_13 = arith.constant 0 : index
    %19 = vector.load %arg5[%c0_10, %c0_11, %c0_12, %c0_13] : memref<1x4x8x8xbf16, #tpu.memory_space<vmem>>, vector<1x4x8x8xbf16>
    %20 = vector.shape_cast %19 : vector<1x4x8x8xbf16> to vector<4x8x8xbf16>
    %21 = vector.shape_cast %18 : vector<4x8x8xbf16> to vector<1x4x8x8xbf16>
    tpu.vector_store %arg5[%c0_10, %c0_11, %c0_12, %c0_13], %21 {strides = array<i32>} : memref<1x4x8x8xbf16, #tpu.memory_space<vmem>>, vector<1x4x8x8xbf16>,
    return
  }
  func.func @transform_0(%arg0: i32) -> (i32, i32, i32) {
    %c0_i32 = arith.constant 0 : i32
    %c0_i32_0 = arith.constant 0 : i32
    %c0_i32_1 = arith.constant 0 : i32
    return %arg0, %c0_i32, %c0_i32_0 : i32, i32, i32
  }
  func.func @transform_1(%arg0: i32) -> (i32, i32) {
    %c0_i32 = arith.constant 0 : i32
    %c0_i32_0 = arith.constant 0 : i32
    %c0_i32_1 = arith.constant 0 : i32
    return %c0_i32, %c0_i32_0 : i32, i32
  }
  func.func @transform_2(%arg0: i32) -> (i32, i32) {
    %c0_i32 = arith.constant 0 : i32
    %c0_i32_0 = arith.constant 0 : i32
    %c0_i32_1 = arith.constant 0 : i32
    return %c0_i32, %c0_i32_0 : i32, i32
  }
  func.func @transform_3(%arg0: i32) -> (i32, i32, i32, i32) {
    %c0_i32 = arith.constant 0 : i32
    %c0_i32_0 = arith.constant 0 : i32
    %c0_i32_1 = arith.constant 0 : i32
    %c0_i32_2 = arith.constant 0 : i32
    return %arg0, %c0_i32, %c0_i32_0, %c0_i32_1 : i32, i32, i32, i32
  }
  func.func @transform_4(%arg0: i32) -> (i32, i32, i32, i32) {
    %c0_i32 = arith.constant 0 : i32
    %c0_i32_0 = arith.constant 0 : i32
    %c0_i32_1 = arith.constant 0 : i32
    %c0_i32_2 = arith.constant 0 : i32
    return %arg0, %c0_i32, %c0_i32_0, %c0_i32_1 : i32, i32, i32, i32
  }
}

</mosaic_0001>

<bundles_post_ra>
// kernel: tpu_custom_call.1
= control target key start
LH: loop header
LB: loop body
LE: loop exit
PB: predicated region body
PF: predicated region fallthrough
CT: control target
= control target key end

     0   :  { %7 = vsyncpa [#allocation3], 0  ;;  %s651_s0 = inlined_call_operand.hbm [shape: f32[8,128], index: 0, kind: input, shape index: {}]   ;;  %s652_s1 = inlined_call_operand.hbm [shape: f32[16,128], index: 1, kind: input, shape index: {}]   ;;  %s653_s2 = inlined_call_operand.hbm [shape: f32[16,128], index: 2, kind: output, shape index: {}]  }
   0x1   :  { %8 = vsyncpa [#allocation6], 0 }
   0x2   :  { %10 = vsyncpa [#allocation6 + $0x1], 0 }
   0x3   :  { %11 = vsyncpa [#allocation4], 0 }
   0x4   :  { %13 = vsyncpa [#allocation4 + $0x1], 0  ;;  %s485_s9 = smov 0   ;;  %s487_s10 = smov 0  }
   0x5   :  { %s489_s11 = smov 0   ;;  %s491_s12 = smov 0  }
   0x6 LB: > { %s506_s13 = sadd.s32 4294967295, %s465_s12   ;;  %s272_s14 = sadd.s32 4294967294, %s465_s12   ;;  %s465_s12 = sphi %s491_s12, %s676_s12   ;;  %s461_s11 = sphi %s489_s11, %s675_s11   ;;  %s457_s10 = sphi %s487_s10, %s674_s10   ;;  %s453_s9 = sphi %s485_s9, %s673_s9  }
   0x7   : > { %p60_p0 = scmp.ne.s32.totalorder %s457_s10, %s453_s9  ;;  %p654_p1 = scmp.eq.s32.totalorder %s506_s13, 0 }
   0x8   : > { %p90_p3 = scmp.eq.s32.totalorder %s272_s14, 1  ;;  %p273_p5 = scmp.ge.s32.totalorder %s465_s12, 1 }
   0x9   : > { %p515_p4 = por %p654_p1, %p60_p0  ;;  %p97_p7 = scmp.lt.s32.totalorder %s465_s12, 3 }
   0xa   : > { %p520_p6 = por %p90_p3, %p60_p0  ;;  %s467_s18 = smov [#allocation2]  }
   0xb   : > { %s658_s15 = scalar_select %p515_p4, 1, 0 }
   0xc   : > { %s659_s16 = scalar_select %p520_p6, 1, 0 }
   0xd   : > { %p525_p8 = pnand %p273_p5, %p97_p7  ;;  %s110_s19 = sshll.u32 %s467_s18, 4  ;;  %s111_s19 = int_to_ptr.vmem [resolvable:$true] %s110_s19 }
   0xe   : > { %s533_s20 = sadd.s32 1, %s465_s12   ;;  %s47_s24 = sadd.s32 1, %s461_s11 }
   0xf   : > { %s660_s17 = scalar_select %p525_p8, 1, 0 }
  0x10   : > { %p294_p10 = pneg %p525_p8  ;;  %s44_s22 = ssub.s32 %s465_s12, %s533_s20 }
  0x11   : > { %p543_p12 = scmp.eq.s32.totalorder %s44_s22, 0  ;;  %p54_p13 = scmp.ne.s32.totalorder %s461_s11, %s457_s10 }
  0x12   : > { %p537_p11 = pnand %p294_p10, %p654_p1  ;;  %s354_s25 = scalar_lea.vmem %s111_s19, 128 }
  0x13   : > { %p355_p3 = scmp.ne.s32.totalorder %s111_s19, %s354_s25  ;;  %p362_p9 = scmp.lt.s32.totalorder %s111_s19, %s111_s19 }
  0x14   : > { %p345_p0 = pneg %p537_p11  ;;  %p363_p2 = scmp.lt.s32.totalorder %s354_s25, %s354_s25 }
  0x16   : > { %p357_p5 = pnand %p355_p3, %p345_p0  ;;  %p364_p10 = por %p363_p2, %p362_p9 }
  0x18   : > { %p358_p7 = pneg %p357_p5 }
  0x1a   : > { %p365_p1 = pnand %p364_p10, %p358_p7 }
  0x1c   : > { %368 = shalt.err (!%p365_p1)
}
  0x1d   : > { %297 = dma.hbm_to_vmem [thread:$0]  (!%p537_p11), %s651_s0, 128, %s111_s19, [#allocation3]  }
  0x1e   : > { %s560_s28 = scalar_select %p543_p12, %s461_s11, %s47_s24  }
  0x1f   : > { %p55_p1 = scmp.eq.s32.totalorder %s465_s12, 0  ;;  %p663_p2 = scmp.eq.s32.totalorder %s506_s13, 1 }
  0x20   : > { %p307_p0 = scmp.lt.s32.totalorder %s465_s12, 2  ;;  %s121_s30 = sand.u32 1, %s461_s11  }
  0x21   : > { %p568_p9 = por %p663_p2, %p54_p13  ;;  %p56_p3 = por %p55_p1, %p54_p13 }
  0x22   : > { %s276_s3 = sshll.u32 %s121_s30, 3  ;;  %s277_s4 = sshll.u32 %s465_s12, 7 }
  0x23   : > { %s664_s29 = scalar_select %p568_p9, 1, 0 }
  0x24   : > { %s581_s7 = scalar_lea.hbm %s652_s1, %s277_s4  ;;  %s125_s8 = scalar_lea.vmem [#allocation5], %s276_s3 }
  0x25   : > { %s132_s14 = sshll.u32 %s125_s8, 4  ;;  %p583_p11 = pnand %p307_p0, %p56_p3  ;;  %s133_s14 = int_to_ptr.vmem [resolvable:$true] %s132_s14 }
  0x26   : > { %s122_s19 = scalar_lea.sflag [#allocation6], %s121_s30  ;;  %s369_s21 = scalar_lea.hbm %s581_s7, 128 }
  0x27   : > { %p370_p12 = scmp.ne.s32.totalorder %s581_s7, %s369_s21  ;;  %p371_p13 = pneg %p583_p11 }
  0x28   : > { %s374_s24 = scalar_lea.hbm %s652_s1, 256  ;;  %p375_p10 = scmp.lt.s32.totalorder %s581_s7, %s652_s1 }
  0x29   : > { %p372_p5 = pnand %p371_p13, %p370_p12  ;;  %p376_p1 = scmp.lt.s32.totalorder %s374_s24, %s369_s21 }
  0x2b   : > { %p373_p7 = pneg %p372_p5  ;;  %p377_p2 = por %p376_p1, %p375_p10 }
  0x2d   : > { %p378_p0 = pnand %p377_p2, %p373_p7 }
  0x2f   : > { %381 = shalt.err (!%p378_p0)
}
  0x30   : > { %s382_s27 = scalar_lea.vmem %s133_s14, 128  ;;  %s468_s30 = smov [#allocation5]  }
  0x31   : > { %p383_p3 = scmp.ne.s32.totalorder %s133_s14, %s382_s27  ;;  %s387_s3 = sshll.u32 %s468_s30, 4  ;;  %s388_s3 = int_to_ptr.vmem [resolvable:$false] %s387_s3 }
  0x32   : > { %s389_s4 = scalar_lea.vmem %s388_s3, 256  ;;  %p390_p12 = scmp.lt.s32.totalorder %s133_s14, %s388_s3 }
  0x33   : > { %p385_p6 = pnand %p383_p3, %p371_p13  ;;  %p391_p5 = scmp.lt.s32.totalorder %s389_s4, %s382_s27 }
  0x35   : > { %p386_p9 = pneg %p385_p6  ;;  %p392_p4 = por %p391_p5, %p390_p12 }
  0x37   : > { %p393_p8 = pnand %p392_p4, %p386_p9 }
  0x39   : > { %396 = shalt.err (!%p393_p8)
}
  0x3a   : > { %301 = dma.hbm_to_vmem [thread:$0]  (!%p583_p11), %s581_s7, 128, %s133_s14, %s122_s19  }
  0x3b   : > { %p666_p7 = scmp.ne.s32.totalorder %s660_s17, 0 }
  0x3c   : > { %p667_p10 = scmp.eq.s32.totalorder (!%p666_p7), %s506_s13, 0 }
  0x3d   : > { %141 = sbr.rel (%p666_p7) target bundleno = 96 (0x60), region = 28 }
  0x42   : > { %440 = dma.done.wait (%p667_p10), [#allocation3], 128   ;;  %p668_p6 = pmov %p667_p10 }
  0x43   : > { %s608_s5 = sand.u32 1, %s457_s10   ;;  %p669_p4 = scmp.ne.s32.totalorder %s658_s15, 0 }
  0x44   : > { %442 = vsyncadd (%p668_p6), [#allocation3], 4294967168  ;;  %s280_s6 = sshll.u32 %s608_s5, 3  ;;  %s148_s8 = scalar_lea.sflag [#allocation6], %s608_s5 }
  0x45   : > { %s151_s18 = scalar_lea.vmem [#allocation5], %s280_s6 }
  0x46   : > { %444 = dma.done.wait (%p669_p4), %s148_s8, 128  }
  0x47   : > { %446 = vsyncadd (%p669_p4), %s148_s8, 4294967168  ;;  %s171_s17 = scalar_lea.vmem [#allocation7], %s280_s6  ;;  %s283_s14 = sshll.u32 %s506_s13, 7  ;;  %v172_v0 = vld [vmem:[%s151_s18] sm:$0xff]  ;;  %v173_v1 = vld [vmem:[#allocation2] sm:$0xff] }
  0x48   : > { %s190_s7 = sshll.u32 %s171_s17, 4  ;;  %v174_v2 = vadd.f32 %v173_v1, %v172_v0  ;;  %s188_s22 = scalar_lea.hbm %s653_s2, %s283_s14  ;;  %s191_s7 = int_to_ptr.vmem [resolvable:$true] %s190_s7 }
  0x49   : > { %s177_s23 = scalar_lea.sflag [#allocation4], %s608_s5  ;;  %s397_s24 = scalar_lea.vmem %s191_s7, 128 }
  0x4a   : > { %175 = vst [vmem:[%s171_s17] sm:$0xff] %v174_v2  ;;  %p398_p8 = scmp.ne.s32.totalorder %s191_s7, %s397_s24  ;;  %p670_p9 = scmp.ne.s32.totalorder %s664_s29, 0 }
  0x4b   : > { %s469_s15 = smov [#allocation7]  }
  0x4c   : > { %p399_p11 = pnand %p398_p8, %p670_p9  ;;  %s401_s25 = sshll.u32 %s469_s15, 4  ;;  %s402_s25 = int_to_ptr.vmem [resolvable:$false] %s401_s25 }
  0x4d   : > { %s403_s26 = scalar_lea.vmem %s402_s25, 256  ;;  %p404_p1 = scmp.lt.s32.totalorder %s191_s7, %s402_s25 }
  0x4e   : > { %p400_p13 = pneg %p399_p11  ;;  %p405_p2 = scmp.lt.s32.totalorder %s403_s26, %s397_s24 }
  0x50   : > { %p406_p0 = por %p405_p2, %p404_p1 }
  0x52   : > { %p407_p3 = pnand %p406_p0, %p400_p13 }
  0x54   : > { %410 = shalt.err (!%p407_p3)
}
  0x55   : > { %s411_s13 = scalar_lea.hbm %s188_s22, 128  ;;  %s415_s3 = scalar_lea.hbm %s653_s2, 256 }
  0x56   : > { %p412_p12 = scmp.ne.s32.totalorder %s188_s22, %s411_s13  ;;  %p416_p10 = scmp.lt.s32.totalorder %s188_s22, %s653_s2 }
  0x57   : > { %p417_p6 = scmp.lt.s32.totalorder %s415_s3, %s411_s13 }
  0x58   : > { %p413_p5 = pnand %p412_p12, %p670_p9 }
  0x59   : > { %p418_p4 = por %p417_p6, %p416_p10 }
  0x5a   : > { %p414_p7 = pneg %p413_p5 }
  0x5c   : > { %p419_p8 = pnand %p418_p4, %p414_p7 }
  0x5e   : > { %422 = shalt.err (!%p419_p8)
}
  0x5f   : > { %292 = dma.vmem_to_hbm [thread:$0]  (%p670_p9), %s191_s7, 128, %s188_s22, %s177_s23  }
  0x60 PF: > { %s202_s6 = sand.u32 1, %s453_s9   ;;  %p671_p11 = scmp.ne.s32.totalorder %s659_s16, 0 }
  0x61   : > { %p672_p13 = scmp.ge.s32.totalorder %s465_s12, 2  ;;  %s203_s8 = scalar_lea.sflag [#allocation4], %s202_s6 }
  0x63   : > { %p303_p1 = pnand %p672_p13, %p671_p11 }
  0x65   : > { %p304_p2 = pneg %p303_p1 }
  0x67   : > { %448 = dma.done.wait (%p304_p2), %s203_s8, 128  }
  0x68   : > { %450 = vsyncadd (%p304_p2), %s203_s8, 4294967168  ;;  %p16_p0 = scmp.ge.s32.totalorder %s533_s20, 4   ;;  %s673_s9 = smov %s457_s10 }
  0x69   : > { %s674_s10 = smov %s461_s11  ;;  %s675_s11 = smov %s560_s28 }
  0x6a   : > { %s676_s12 = smov %s533_s20  ;;  %18 = sbr.rel (!%p16_p0) target bundleno = 6 (0x6), region = 78 }
  0x6f   :  { %208 = vsyncpa [#allocation3], 1 }
  0x70   :  { %210 = vsyncpa [#allocation3 + $0x1], 1 }
  0x71   :  { %211 = vsyncpa [#allocation6], 1 }
  0x72   :  { %213 = vsyncpa [#allocation6 + $0x1], 1 }
  0x73   :  { %214 = vsyncpa [#allocation4], 1 }
  0x74   :  { %216 = vsyncpa [#allocation4 + $0x1], 1 }

// kernel: tpu_custom_call.1
= control target key start
LH: loop header
LB: loop body
LE: loop exit
PB: predicated region body
PF: predicated region fallthrough
CT: control target
= control target key end

     0   :  { %10 = vsyncpa [#allocation3], 0  ;;  %s2016_s0 = inlined_call_operand.hbm [shape: f32[2,8,32], index: 0, kind: input, shape index: {}]   ;;  %s2017_s1 = inlined_call_operand.hbm [shape: bf16[32,64], index: 1, kind: input, shape index: {}]   ;;  %s2018_s2 = inlined_call_operand.vmem [shape: f32[1,64], index: 2, kind: input, shape index: {}]   ;;  %s2019_s3 = inlined_call_operand.hbm [shape: bf16[2,4,8,8], index: 3, kind: output, shape index: {0}]   ;;  %s2020_s4 = inlined_call_operand.hbm [shape: bf16[2,4,8,8], index: 4, kind: output, shape index: {1}]  }
   0x1   :  { %12 = vsyncpa [#allocation3 + $0x1], 0 }
   0x2   :  { %13 = vsyncpa [#allocation6], 0 }
   0x3   :  { %14 = vsyncpa [#allocation4], 0 }
   0x4   :  { %16 = vsyncpa [#allocation4 + $0x1], 0 }
   0x5   :  { %17 = vsyncpa [#allocation9], 0 }
   0x6   :  { %19 = vsyncpa [#allocation9 + $0x1], 0  ;;  %s1727_s15 = smov 0   ;;  %s1729_s16 = smov 0  }
   0x7   :  { %s1731_s17 = smov 0   ;;  %s1733_s18 = smov 0  }
   0x8 LB: > { %s1748_s19 = sadd.s32 4294967295, %s1684_s18   ;;  %s1418_s20 = sadd.s32 4294967294, %s1684_s18   ;;  %s1684_s18 = sphi %s1733_s18, %s2042_s18   ;;  %s1680_s17 = sphi %s1731_s17, %s2041_s17   ;;  %s1676_s16 = sphi %s1729_s16, %s2040_s16   ;;  %s1672_s15 = sphi %s1727_s15, %s2039_s15  }
   0x9   : > { %p45_p0 = scmp.ne.s32.totalorder %s1676_s16, %s1672_s15  ;;  %p2021_p1 = scmp.eq.s32.totalorder %s1748_s19, 0 }
   0xa   : > { %p117_p3 = scmp.eq.s32.totalorder %s1418_s20, 1  ;;  %p1419_p5 = scmp.ge.s32.totalorder %s1684_s18, 1 }
   0xb   : > { %p1757_p4 = por %p2021_p1, %p45_p0  ;;  %p150_p7 = scmp.lt.s32.totalorder %s1684_s18, 3 }
   0xc   : > { %p1762_p6 = por %p117_p3, %p45_p0  ;;  %s1686_s24 = smov [#allocation5]  }
   0xd   : > { %s2025_s21 = scalar_select %p1757_p4, 1, 0 }
   0xe   : > { %s2026_s22 = scalar_select %p1762_p6, 1, 0 }
   0xf   : > { %p1767_p8 = pnand %p1419_p5, %p150_p7  ;;  %s162_s25 = sshll.u32 %s1686_s24, 4  ;;  %s163_s25 = int_to_ptr.vmem [resolvable:$true] %s162_s25 }
  0x10   : > { %s1781_s27 = sadd.s32 1, %s1684_s18   ;;  %s32_s28 = sadd.s32 1, %s1680_s17 }
  0x11   : > { %s2027_s23 = scalar_select %p1767_p8, 1, 0 }
  0x12   : > { %p1466_p9 = pneg %p1767_p8  ;;  %s29_s29 = ssub.s32 %s1684_s18, %s1781_s27 }
  0x13   : > { %s1543_s30 = scalar_lea.vmem %s163_s25, 256  ;;  %p1551_p5 = scmp.lt.s32.totalorder %s163_s25, %s163_s25 }
  0x14   : > { %p1776_p11 = pnand %p1466_p9, %p2021_p1  ;;  %p1544_p13 = scmp.ne.s32.totalorder %s163_s25, %s1543_s30 }
  0x15   : > { %p1552_p7 = scmp.lt.s32.totalorder %s1543_s30, %s1543_s30 }
  0x16   : > { %p1534_p12 = pneg %p1776_p11 }
  0x17   : > { %p1553_p10 = por %p1552_p7, %p1551_p5 }
  0x18   : > { %p1546_p0 = pnand %p1544_p13, %p1534_p12 }
  0x1a   : > { %p1547_p3 = pneg %p1546_p0 }
  0x1c   : > { %p1554_p2 = pnand %p1553_p10, %p1547_p3 }
  0x1e   : > { %1557 = shalt.err (!%p1554_p2)
}
  0x1f   : > { %s1687_s5 = smov 64   ;;  %s1688_s6 = smov 4  }
  0x20   : > { %1469 = dma.hbm_to_vmem [thread:$0]  (!%p1776_p11), %s2017_s1, 256, %s163_s25, [#allocation6], %s1687_s5, %s1687_s5, %s1688_s6  }
  0x21   : > { %p30_p9 = scmp.eq.s32.totalorder %s29_s29, 0  ;;  %p39_p12 = scmp.ne.s32.totalorder %s1680_s17, %s1676_s16 }
  0x22   : > { %p40_p10 = scmp.eq.s32.totalorder %s1684_s18, 0  ;;  %p1482_p2 = scmp.lt.s32.totalorder %s1684_s18, 2 }
  0x23   : > { %s1798_s9 = scalar_select %p30_p9, %s1680_s17, %s32_s28  }
  0x24   : > { %p41_p13 = por %p40_p10, %p39_p12  ;;  %p2029_p0 = scmp.eq.s32.totalorder %s1748_s19, 1 }
  0x25   : > { %s179_s11 = sand.u32 1, %s1680_s17   ;;  %s1423_s12 = sshll.u32 %s1684_s18, 7 }
  0x26   : > { %p1802_p3 = por %p2029_p0, %p39_p12  ;;  %s1422_s13 = sshll.u32 %s179_s11, 3 }
  0x27   : > { %s1811_s24 = scalar_lea.hbm %s2016_s0, %s1423_s12  ;;  %s183_s25 = scalar_lea.vmem [#allocation2], %s1422_s13 }
  0x28   : > { %s2030_s10 = scalar_select %p1802_p3, 1, 0 }
  0x29   : > { %s190_s26 = sshll.u32 %s183_s25, 4  ;;  %p1813_p11 = pnand %p1482_p2, %p41_p13  ;;  %s191_s26 = int_to_ptr.vmem [resolvable:$true] %s190_s26 }
  0x2a   : > { %s180_s29 = scalar_lea.sflag [#allocation3], %s179_s11  ;;  %s1558_s30 = scalar_lea.hbm %s1811_s24, 128 }
  0x2b   : > { %p1559_p5 = scmp.ne.s32.totalorder %s1811_s24, %s1558_s30  ;;  %p1560_p7 = pneg %p1813_p11 }
  0x2c   : > { %s1563_s7 = scalar_lea.hbm %s2016_s0, 256  ;;  %p1564_p10 = scmp.lt.s32.totalorder %s1811_s24, %s2016_s0 }
  0x2d   : > { %p1561_p9 = pnand %p1560_p7, %p1559_p5  ;;  %p1565_p2 = scmp.lt.s32.totalorder %s1563_s7, %s1558_s30 }
  0x2f   : > { %p1562_p12 = pneg %p1561_p9  ;;  %p1566_p13 = por %p1565_p2, %p1564_p10 }
  0x31   : > { %p1567_p0 = pnand %p1566_p13, %p1562_p12 }
  0x33   : > { %1570 = shalt.err (!%p1567_p0)
}
  0x34   : > { %s1571_s13 = scalar_lea.vmem %s191_s26, 128  ;;  %s1689_s11 = smov [#allocation2]  }
  0x35   : > { %p1572_p1 = scmp.ne.s32.totalorder %s191_s26, %s1571_s13  ;;  %s1576_s14 = sshll.u32 %s1689_s11, 4  ;;  %s1577_s14 = int_to_ptr.vmem [resolvable:$false] %s1576_s14 }
  0x36   : > { %s1578_s20 = scalar_lea.vmem %s1577_s14, 256  ;;  %p1579_p5 = scmp.lt.s32.totalorder %s191_s26, %s1577_s14 }
  0x37   : > { %p1574_p6 = pnand %p1572_p1, %p1560_p7  ;;  %p1580_p9 = scmp.lt.s32.totalorder %s1578_s20, %s1571_s13 }
  0x39   : > { %p1575_p3 = pneg %p1574_p6  ;;  %p1581_p4 = por %p1580_p9, %p1579_p5 }
  0x3b   : > { %p1582_p8 = pnand %p1581_p4, %p1575_p3 }
  0x3d   : > { %1585 = shalt.err (!%p1582_p8)
}
  0x3e   : > { %1473 = dma.hbm_to_vmem [thread:$0]  (!%p1813_p11), %s1811_s24, 128, %s191_s26, %s180_s29  }
  0x3f   : > { %p2032_p12 = scmp.ne.s32.totalorder %s2027_s23, 0 }
  0x40   : > { %s1834_s25 = sand.u32 (!%p2032_p12), 1, %s1676_s16   ;;  %p2033_p1 = scmp.ne.s32.totalorder (!%p2032_p12), %s2025_s21, 0 }
  0x41   : > { %199 = sbr.rel (%p2032_p12) target bundleno = 723 (0x2d3), region = 32  ;;  %s1425_s30 = sshll.u32 (!%p2032_p12), %s1834_s25, 3 }
  0x42   : > { %s202_s5 = scalar_lea.sflag (!%p2032_p12), [#allocation3], %s1834_s25  ;;  %s205_s6 = scalar_lea.vmem (!%p2032_p12), [#allocation2], %s1425_s30 }
  0x46   : > { %1655 = dma.done.wait (%p2033_p1), %s202_s5, 128  }
  0x47   : > { %1657 = vsyncadd (%p2033_p1), %s202_s5, 4294967168  ;;  %p2034_p4 = scmp.eq.s32.totalorder %s1748_s19, 0 }
  0x49   : > { %1659 = dma.done.wait (%p2034_p4), [#allocation6], 256   ;;  %p2035_p6 = pmov %p2034_p4 }
  0x4a   : > { %v1690_v0 = vmov 0.0   ;;  %vm1691_vm0 = vmmov 0   ;;  %v1530_v1 = vld [vmem:[#allocation5 + $0x8] sm:$0xff]   ;;  %v1531_v2 = vld [vmem:[#allocation5] sm:$0xff]   ;;  %v240_v3 = vld [vmem:[%s205_s6] sm:$0xff]  ;;  %vm265_vm1 = vcmask 261120   ;;  %v324_v13 = vlaneseq }
  0x4b   : > { %1661 = vsyncadd (%p2035_p6), [#allocation6], 4294967040  ;;  %1448 = vmatprep.subr.bf16.mxu0 %v1690_v0  ;;  %1452 = vmatprep.mubr.msk.bf16.mxu0 %vm1691_vm0, %v1690_v0  ;;  %v241_v4 = vpack.c.bf16 %v240_v3, %v240_v3  ;;  %v1429_v5 = vld [vmem:[%s2018_s2] ss:$0 sm:$0xff]  ;;  %s1692_s24 = smov 104   ;;  %s1693_s26 = smov 120  }
  0x4c   : > { %1449 = vmatpush3.bf16.msra.mxu0 %v1530_v1  ;;  %s1694_s28 = smov 96   ;;  %s1695_s29 = smov 112   ;;  %v1696_v11 = vmov 1983009808   ;;  %v325_v15 = vshrl.u32 %v324_v13, 7  ;;  %vm1187_vm2 = vcmask 60416  }
  0x4d   : > { %1450 = vmatprep.subr.bf16.mxu0 %v1690_v0  ;;  %v322_v12 = vunpack.c.l.s4 %v1696_v11  ;;  %v1697_v16 = vmov 1934713408   ;;  %s1427_s7 = sshll.u32 %s1834_s25, 4  ;;  %s1443_s8 = sshll.u32 %s1748_s19, 8 }
  0x4e   : > { %v354_v17 = vunpack.c.l.s4 %v1697_v16  ;;  %s238_s12 = scalar_lea.vmem [#allocation8], %s1427_s7  ;;  %s1917_s20 = scalar_lea.hbm %s2020_s4, %s1443_s8 }
  0x4f   : > { %v323_v14 = vunpack.c.0.s8 %v322_v12  ;;  %s1303_s13 = sshll.u32 %s238_s12, 4  ;;  %s1274_s30 = scalar_lea.sflag [#allocation9], %s1834_s25  ;;  %s1919_s13 = int_to_ptr.vmem [resolvable:$true] %s1303_s13 }
  0x50   : > { %1451 = vmatpush3.bf16.msra.mxu0 %v1531_v2  ;;  %v355_v22 = vunpack.c.0.s8 %v354_v17  ;;  %s1586_s5 = scalar_lea.vmem %s1919_s13, 256  ;;  %p2036_p3 = scmp.ne.s32.totalorder %s2030_s10, 0 }
  0x51   : > { %v1853_v21 = vsub.s32 %v323_v14, %v325_v15  ;;  %p1587_p8 = scmp.ne.s32.totalorder %s1919_s13, %s1586_s5  ;;  %s1698_s6 = smov [#allocation8]  }
  0x52   : > { %v1857_v29 = vsub.s32 %v355_v22, %v325_v15  ;;  %s1590_s21 = sshll.u32 %s1698_s6, 4  ;;  %s1591_s21 = int_to_ptr.vmem [resolvable:$false] %s1590_s21 }
  0x53   : > { %1453 = vmatmul.mubr.msk.bf16.vlgmr.msra.gmra.mxu0 %vm265_vm1, %v241_v4  ;;  %p1588_p11 = pnand %p1587_p8, %p2036_p3  ;;  %s1592_s23 = scalar_lea.vmem %s1591_s21, 512 }
  0x54   : > { %p1593_p10 = scmp.lt.s32.totalorder %s1919_s13, %s1591_s21  ;;  %p1594_p2 = scmp.lt.s32.totalorder %s1592_s23, %s1586_s5 }
  0x55   : > { %p1589_p7 = pneg %p1588_p11 }
  0x56   : > { %p1595_p13 = por %p1594_p2, %p1593_p10 }
  0x58   : > { %p1596_p0 = pnand %p1595_p13, %p1589_p7 }
 0x113   : > { %v303_v6 = vpop.f32.mrf.mxu0 }
 0x114   : > { %v304_v7 = vadd.f32 %v1429_v5, %v303_v6 }
 0x115   : > { %v1454_v8 = vpop.f32.mrf.mxu0 }
 0x116   : > { %316 = vrot.lane.b32.xlu1 %v304_v7, %s1692_s24  ;;  %310 = vrot.lane.b32.xlu0 %v304_v7, %s1693_s26 }
 0x117   : > { %v306_v9 = vpop.f32.mrf.mxu0 }
 0x119   : > { %v1455_v10 = vpop.f32.mrf.mxu0 }
 0x11a   : > { %387 = vrot.lane.b32.xlu1 %v304_v7, %s1694_s28  ;;  %313 = vrot.lane.b32.xlu0 %v304_v7, %s1695_s29 }
 0x188   : > { %v317_v18 = vpop.permute.xlu1 %316  ;;  %v311_v19 = vpop.permute.xlu0 %310 }
 0x189   : > { %v335_v20 = vcombine.low %v311_v19, %v317_v18  ;;  %v336_v24 = vcombine.high %v311_v19, %v317_v18 }
 0x18b   : > { %v343_v28 = vrot.slane %v335_v20, %v1853_v21  ;;  %v350_v33 = vrot.slane %v336_v24, %v1853_v21 }
 0x18c   : > { %v314_v23 = vpop.permute.xlu0 %313  ;;  %v1872_v44 = vpop.permute.xlu1 %387 }
 0x18d   : > { %v319_v25 = vcombine.low %v304_v7, %v314_v23  ;;  %v320_v26 = vcombine.high %v304_v7, %v314_v23 }
 0x18f   : > { %v327_v27 = vrot.slane %v319_v25, %v1853_v21  ;;  %v334_v30 = vrot.slane %v320_v26, %v1853_v21 }
 0x191   : > { %v352_v31 = vcombine.high %v327_v27, %v343_v28  ;;  %v351_v32 = vcombine.low %v327_v27, %v343_v28  ;;  %v367_v36 = vcombine.low %v334_v30, %v350_v33  ;;  %v368_v39 = vcombine.high %v334_v30, %v350_v33 }
 0x193   : > { %v366_v34 = vrot.slane %v352_v31, %v1857_v29  ;;  %v359_v35 = vrot.slane %v351_v32, %v1857_v29  ;;  %v375_v37 = vrot.slane %v367_v36, %v1857_v29  ;;  %v382_v40 = vrot.slane %v368_v39, %v1857_v29 }
 0x195   : > { %531 = vxpose.xlu0.b32.start.end [1/1] (short) (narrow) %v366_v34, 8  ;;  %467 = vxpose.xlu1.b32.start.end [1/1] (short) (narrow) %v359_v35, 8  ;;  %v383_v38 = vcombine.high %v359_v35, %v1690_v0  ;;  %v384_v41 = vcombine.high %v366_v34, %v1690_v0  ;;  %v385_v42 = vcombine.high %v375_v37, %v1690_v0 }
 0x196   : > { %v386_v43 = vcombine.high %v382_v40, %v1690_v0 }
 0x199   : > { %595 = vxpose.xlu1.b32.start.end [1/1] (short) (narrow) %v375_v37, 8  ;;  %499 = vxpose.xlu0.b32.start.end [1/1] (short) (narrow) %v383_v38, 8 }
 0x19d   : > { %659 = vxpose.xlu1.b32.start.end [1/1] (short) (narrow) %v382_v40, 8  ;;  %563 = vxpose.xlu0.b32.start.end [1/1] (short) (narrow) %v384_v41, 8 }
 0x1a1   : > { %627 = vxpose.xlu0.b32.start.end [1/1] (short) (narrow) %v385_v42, 8 }
 0x1a5   : > { %691 = vxpose.xlu0.b32.start.end [1/1] (short) (narrow) %v386_v43, 8 }
 0x1bb   : > { %391 = vrot.lane.b32.xlu1 %v314_v23, %s1694_s28 }
 0x1bf   : > { %393 = vrot.lane.b32.xlu1 %v317_v18, %s1694_s28 }
 0x1ce   : > { %389 = vrot.lane.b32.xlu0 %v311_v19, %s1694_s28 }
 0x211   : > { %v547_v45 = vpop.trf.xlu0  ;;  %v483_v46 = vpop.trf.xlu1 }
 0x212   : > { %v723_v53 = vcombine.low %v483_v46, %v547_v45  ;;  %v724_v59 = vcombine.high %v483_v46, %v547_v45 }
 0x214   : > { %v731_v60 = vrot.slane %v723_v53, %v1853_v21  ;;  %v738_v5 = vrot.slane %v724_v59, %v1853_v21 }
 0x215   : > { %v515_v47 = vpop.trf.xlu0  ;;  %v611_v48 = vpop.trf.xlu1 }
 0x219   : > { %v579_v49 = vpop.trf.xlu0  ;;  %v675_v51 = vpop.trf.xlu1 }
 0x21a   : > { %v739_v50 = vcombine.low %v515_v47, %v579_v49  ;;  %v740_v54 = vcombine.high %v515_v47, %v579_v49  ;;  %v755_v55 = vcombine.low %v611_v48, %v675_v51  ;;  %v756_v57 = vcombine.high %v611_v48, %v675_v51 }
 0x21c   : > { %v747_v56 = vrot.slane %v739_v50, %v1853_v21  ;;  %v754_v63 = vrot.slane %v740_v54, %v1853_v21  ;;  %v763_v0 = vrot.slane %v755_v55, %v1853_v21  ;;  %v770_v2 = vrot.slane %v756_v57, %v1853_v21 }
 0x21d   : > { %v643_v52 = vpop.trf.xlu0 }
 0x21e   : > { %v787_v1 = vcombine.low %v731_v60, %v747_v56  ;;  %v788_v11 = vcombine.high %v731_v60, %v747_v56  ;;  %v803_v12 = vcombine.low %v738_v5, %v754_v63  ;;  %v804_v20 = vcombine.high %v738_v5, %v754_v63 }
 0x220   : > { %v795_v9 = vrot.slane %v787_v1, %v1857_v29  ;;  %v802_v18 = vrot.slane %v788_v11, %v1857_v29  ;;  %v811_v19 = vrot.slane %v803_v12, %v1857_v29  ;;  %v818_v25 = vrot.slane %v804_v20, %v1857_v29 }
 0x221   : > { %v707_v58 = vpop.trf.xlu0 }
 0x222   : > { %v771_v61 = vcombine.low %v643_v52, %v707_v58  ;;  %v772_v62 = vcombine.high %v643_v52, %v707_v58 }
 0x224   : > { %v779_v3 = vrot.slane %v771_v61, %v1853_v21  ;;  %v786_v4 = vrot.slane %v772_v62, %v1853_v21 }
 0x226   : > { %v819_v6 = vcombine.low %v763_v0, %v779_v3  ;;  %v820_v7 = vcombine.high %v763_v0, %v779_v3  ;;  %v835_v8 = vcombine.low %v770_v2, %v786_v4  ;;  %v836_v13 = vcombine.high %v770_v2, %v786_v4 }
 0x228   : > { %v827_v10 = vrot.slane %v819_v6, %v1857_v29  ;;  %v834_v16 = vrot.slane %v820_v7, %v1857_v29  ;;  %v843_v17 = vrot.slane %v835_v8, %v1857_v29  ;;  %v850_v24 = vrot.slane %v836_v13, %v1857_v29 }
 0x22a   : > { %v852_v14 = vcombine.high %v795_v9, %v827_v10  ;;  %v851_v15 = vcombine.low %v795_v9, %v827_v10  ;;  %v853_v22 = vcombine.low %v802_v18, %v834_v16  ;;  %v855_v23 = vcombine.low %v811_v19, %v843_v17 }
 0x22b   : > { %v854_v26 = vcombine.high %v802_v18, %v834_v16  ;;  %v857_v27 = vcombine.low %v818_v25, %v850_v24  ;;  %v856_v28 = vcombine.high %v811_v19, %v843_v17  ;;  %v858_v31 = vcombine.high %v818_v25, %v850_v24 }
 0x22c   : > { %891 = vxpose.xlu0.b32.start.end [1/1] (short) (narrow) %v852_v14, 8  ;;  %859 = vxpose.xlu1.b32.start.end [1/1] (short) (narrow) %v851_v15, 8 }
 0x22d   : > { %v392_v30 = vpop.permute.xlu1 %391 }
 0x22e   : > { %v399_v32 = vcombine.low %v1872_v44, %v392_v30  ;;  %v400_v33 = vcombine.high %v1872_v44, %v392_v30 }
 0x230   : > { %923 = vxpose.xlu0.b32.start.end [1/1] (short) (narrow) %v853_v22, 8  ;;  %987 = vxpose.xlu1.b32.start.end [1/1] (short) (narrow) %v855_v23, 8  ;;  %v407_v38 = vrot.slane %v399_v32, %v1853_v21  ;;  %v414_v39 = vrot.slane %v400_v33, %v1853_v21 }
 0x231   : > { %v394_v34 = vpop.permute.xlu1 %393 }
 0x234   : > { %955 = vxpose.xlu0.b32.start.end [1/1] (short) (narrow) %v854_v26, 8  ;;  %1051 = vxpose.xlu1.b32.start.end [1/1] (short) (narrow) %v857_v27, 8 }
 0x238   : > { %1019 = vxpose.xlu0.b32.start.end [1/1] (short) (narrow) %v856_v28, 8 }
 0x23c   : > { %1083 = vxpose.xlu0.b32.start.end [1/1] (short) (narrow) %v858_v31, 8 }
 0x240   : > { %v390_v35 = vpop.permute.xlu0 %389 }
 0x241   : > { %v415_v36 = vcombine.low %v390_v35, %v394_v34  ;;  %v416_v37 = vcombine.high %v390_v35, %v394_v34 }
 0x243   : > { %v423_v40 = vrot.slane %v415_v36, %v1853_v21  ;;  %v430_v41 = vrot.slane %v416_v37, %v1853_v21 }
 0x245   : > { %v431_v42 = vcombine.low %v407_v38, %v423_v40  ;;  %v432_v43 = vcombine.high %v407_v38, %v423_v40  ;;  %v447_v45 = vcombine.low %v414_v39, %v430_v41  ;;  %v448_v46 = vcombine.high %v414_v39, %v430_v41 }
 0x247   : > { %v439_v47 = vrot.slane %v431_v42, %v1857_v29  ;;  %v446_v44 = vrot.slane %v432_v43, %v1857_v29  ;;  %v455_v48 = vrot.slane %v447_v45, %v1857_v29  ;;  %v462_v49 = vrot.slane %v448_v46, %v1857_v29 }
 0x249   : > { %v1192_v50 = vcombine.low %v439_v47, %v446_v44  ;;  %v1433_v51 = vcombine.high %v439_v47, %v446_v44  ;;  %v1208_v52 = vcombine.low %v455_v48, %v462_v49  ;;  %v1434_v53 = vcombine.high %v455_v48, %v462_v49 }
 0x24b   : > { %v1199_v54 = vrot.slane %v1192_v50, %v1853_v21  ;;  %v1207_v55 = vrot.slane %v1433_v51, %v1853_v21  ;;  %v1215_v56 = vrot.slane %v1208_v52, %v1853_v21  ;;  %v1223_v57 = vrot.slane %v1434_v53, %v1853_v21 }
 0x24d   : > { %v1224_v58 = vcombine.low %v1199_v54, %v1207_v55  ;;  %v1225_v59 = vcombine.high %v1199_v54, %v1207_v55  ;;  %v1240_v60 = vcombine.low %v1215_v56, %v1223_v57  ;;  %v1241_v61 = vcombine.high %v1215_v56, %v1223_v57 }
 0x24f   : > { %v1232_v62 = vrot.slane %v1224_v58, %v1857_v29  ;;  %v1239_v63 = vrot.slane %v1225_v59, %v1857_v29  ;;  %v1248_v0 = vrot.slane %v1240_v60, %v1857_v29  ;;  %v1255_v1 = vrot.slane %v1241_v61, %v1857_v29 }
 0x251   : > { %v1256_v2 = vcombine.low %v1232_v62, %v1248_v0  ;;  %v1257_v3 = vcombine.high %v1232_v62, %v1248_v0  ;;  %v1258_v4 = vcombine.low %v1239_v63, %v1255_v1  ;;  %v1259_v5 = vcombine.high %v1239_v63, %v1255_v1 }
 0x253   : > { %v1260_v6 = vpack.c.bf16 %v1256_v2, %v1256_v2  ;;  %v1261_v7 = vpack.c.bf16 %v1257_v3, %v1257_v3  ;;  %v1262_v8 = vpack.c.bf16 %v1258_v4, %v1258_v4  ;;  %v1263_v9 = vpack.c.bf16 %v1259_v5, %v1259_v5 }
 0x255   : > { %1264 = vst.msk [vmem:[%s238_s12] sm:$0xf] %vm1187_vm2, %v1260_v6  ;;  %1265 = vst.msk [vmem:[%s238_s12 + $0x4] sm:$0xf] %vm1187_vm2, %v1261_v7 }
 0x256   : > { %1266 = vst.msk [vmem:[%s238_s12 + $0x8] sm:$0xf] %vm1187_vm2, %v1262_v8  ;;  %1267 = vst.msk [vmem:[%s238_s12 + $0xc] sm:$0xf] %vm1187_vm2, %v1263_v9 }
 0x257   : > { %1599 = shalt.err (!%p1596_p0)
}
 0x258   : > { %s1600_s24 = scalar_lea.hbm %s1917_s20, 256  ;;  %s1604_s29 = scalar_lea.hbm %s2020_s4, 512 }
 0x259   : > { %p1601_p5 = scmp.ne.s32.totalorder %s1917_s20, %s1600_s24  ;;  %p1605_p1 = scmp.lt.s32.totalorder %s1917_s20, %s2020_s4 }
 0x25a   : > { %p1606_p4 = scmp.lt.s32.totalorder %s1604_s29, %s1600_s24 }
 0x25b   : > { %p1602_p9 = pnand %p1601_p5, %p2036_p3 }
 0x25c   : > { %p1607_p6 = por %p1606_p4, %p1605_p1 }
 0x25d   : > { %p1603_p12 = pneg %p1602_p9 }
 0x25f   : > { %p1608_p8 = pnand %p1607_p6, %p1603_p12 }
 0x261   : > { %1611 = shalt.err (!%p1608_p8)
}
 0x262   : > { %s1699_s14 = smov 64   ;;  %s1700_s5 = smov 4  }
 0x263   : > { %1463 = dma.vmem_to_hbm [thread:$0]  (%p2036_p3), %s1919_s13, 256, %s1917_s20, %s1274_s30, %s1699_s14, %s1699_s14, %s1700_s5  }
 0x264   : > { %s231_s13 = scalar_lea.vmem [#allocation7], %s1427_s7  ;;  %s1966_s21 = scalar_lea.hbm %s2019_s3, %s1443_s8 }
 0x265   : > { %s1287_s20 = sshll.u32 %s231_s13, 4  ;;  %s1269_s7 = scalar_lea.sflag [#allocation4], %s1834_s25  ;;  %s1968_s20 = int_to_ptr.vmem [resolvable:$true] %s1287_s20 }
 0x266   : > { %s1612_s19 = scalar_lea.vmem %s1968_s20, 256  ;;  %s1701_s8 = smov [#allocation7]  }
 0x267   : > { %p1613_p11 = scmp.ne.s32.totalorder %s1968_s20, %s1612_s19  ;;  %s1616_s23 = sshll.u32 %s1701_s8, 4  ;;  %s1617_s23 = int_to_ptr.vmem [resolvable:$false] %s1616_s23 }
 0x268   : > { %s1618_s24 = scalar_lea.vmem %s1617_s23, 512  ;;  %p1619_p2 = scmp.lt.s32.totalorder %s1968_s20, %s1617_s23 }
 0x269   : > { %p1614_p7 = pnand %p1613_p11, %p2036_p3  ;;  %p1620_p13 = scmp.lt.s32.totalorder %s1618_s24, %s1612_s19 }
 0x26b   : > { %p1615_p10 = pneg %p1614_p7  ;;  %p1621_p0 = por %p1620_p13, %p1619_p2 }
 0x26d   : > { %p1622_p5 = pnand %p1621_p0, %p1615_p10 }
 0x2a8   : > { %v907_v10 = vpop.trf.xlu0  ;;  %v875_v11 = vpop.trf.xlu1 }
 0x2ac   : > { %v939_v12 = vpop.trf.xlu0  ;;  %v1003_v13 = vpop.trf.xlu1 }
 0x2ad   : > { %v1115_v18 = vcombine.low %v875_v11, %v939_v12 }
 0x2af   : > { %v1122_v23 = vrot.slane %v1115_v18, %v1853_v21 }
 0x2b0   : > { %v971_v14 = vpop.trf.xlu0  ;;  %v1067_v16 = vpop.trf.xlu1 }
 0x2b1   : > { %v1123_v15 = vcombine.low %v907_v10, %v971_v14  ;;  %v1131_v20 = vcombine.low %v1003_v13, %v1067_v16 }
 0x2b3   : > { %v1130_v19 = vrot.slane %v1123_v15, %v1853_v21  ;;  %v1138_v27 = vrot.slane %v1131_v20, %v1853_v21 }
 0x2b4   : > { %v1035_v17 = vpop.trf.xlu0 }
 0x2b5   : > { %v1147_v25 = vcombine.low %v1122_v23, %v1130_v19  ;;  %v1148_v26 = vcombine.high %v1122_v23, %v1130_v19 }
 0x2b7   : > { %v1155_v32 = vrot.slane %v1147_v25, %v1857_v29  ;;  %v1162_v33 = vrot.slane %v1148_v26, %v1857_v29 }
 0x2b8   : > { %v1099_v22 = vpop.trf.xlu0 }
 0x2b9   : > { %v1139_v24 = vcombine.low %v1035_v17, %v1099_v22 }
 0x2bb   : > { %v1146_v28 = vrot.slane %v1139_v24, %v1853_v21 }
 0x2bd   : > { %v1163_v30 = vcombine.low %v1138_v27, %v1146_v28  ;;  %v1164_v31 = vcombine.high %v1138_v27, %v1146_v28 }
 0x2bf   : > { %v1171_v34 = vrot.slane %v1163_v30, %v1857_v29  ;;  %v1178_v35 = vrot.slane %v1164_v31, %v1857_v29 }
 0x2c1   : > { %v1179_v36 = vcombine.low %v1155_v32, %v1171_v34  ;;  %v1180_v37 = vcombine.high %v1155_v32, %v1171_v34  ;;  %v1181_v38 = vcombine.low %v1162_v33, %v1178_v35  ;;  %v1182_v21 = vcombine.high %v1162_v33, %v1178_v35 }
 0x2c3   : > { %v1183_v39 = vpack.c.bf16 %v1179_v36, %v1179_v36  ;;  %v1184_v40 = vpack.c.bf16 %v1180_v37, %v1180_v37  ;;  %v1185_v41 = vpack.c.bf16 %v1181_v38, %v1181_v38  ;;  %v1186_v42 = vpack.c.bf16 %v1182_v21, %v1182_v21 }
 0x2c5   : > { %1188 = vst.msk [vmem:[%s231_s13] sm:$0xf] %vm1187_vm2, %v1183_v39  ;;  %1189 = vst.msk [vmem:[%s231_s13 + $0x4] sm:$0xf] %vm1187_vm2, %v1184_v40 }
 0x2c6   : > { %1190 = vst.msk [vmem:[%s231_s13 + $0x8] sm:$0xf] %vm1187_vm2, %v1185_v41  ;;  %1191 = vst.msk [vmem:[%s231_s13 + $0xc] sm:$0xf] %vm1187_vm2, %v1186_v42 }
 0x2c7   : > { %1625 = shalt.err (!%p1622_p5)
}
 0x2c8   : > { %s1626_s26 = scalar_lea.hbm %s1966_s21, 256  ;;  %s1630_s29 = scalar_lea.hbm %s2019_s3, 512 }
 0x2c9   : > { %p1627_p9 = scmp.ne.s32.totalorder %s1966_s21, %s1626_s26  ;;  %p1631_p4 = scmp.lt.s32.totalorder %s1966_s21, %s2019_s3 }
 0x2ca   : > { %p1632_p6 = scmp.lt.s32.totalorder %s1630_s29, %s1626_s26 }
 0x2cb   : > { %p1628_p12 = pnand %p1627_p9, %p2036_p3 }
 0x2cc   : > { %p1633_p8 = por %p1632_p6, %p1631_p4 }
 0x2cd   : > { %p1629_p1 = pneg %p1628_p12 }
 0x2cf   : > { %p1634_p11 = pnand %p1633_p8, %p1629_p1 }
 0x2d1   : > { %1637 = shalt.err (!%p1634_p11)
}
 0x2d2   : > { %1462 = dma.vmem_to_hbm [thread:$0]  (%p2036_p3), %s1968_s20, 256, %s1966_s21, %s1269_s7, %s1699_s14, %s1699_s14, %s1700_s5  }
 0x2d3 PF: > { %s1318_s13 = sand.u32 1, %s1672_s15   ;;  %p2037_p7 = scmp.ne.s32.totalorder %s2026_s22, 0 }
 0x2d4   : > { %p2038_p10 = scmp.ge.s32.totalorder %s1684_s18, 2  ;;  %s1319_s30 = scalar_lea.sflag [#allocation4], %s1318_s13 }
 0x2d6   : > { %p1475_p2 = pnand %p2038_p10, %p2037_p7 }
 0x2d8   : > { %p1476_p13 = pneg %p1475_p2 }
 0x2da   : > { %1663 = dma.done.wait (%p1476_p13), %s1319_s30, 256  }
 0x2db   : > { %1665 = vsyncadd (%p1476_p13), %s1319_s30, 4294967040  ;;  %s1328_s6 = scalar_lea.sflag [#allocation9], %s1318_s13 }
 0x2dc   : > { %1667 = dma.done.wait (%p1476_p13), %s1328_s6, 256  }
 0x2dd   : > { %1669 = vsyncadd (%p1476_p13), %s1328_s6, 4294967040  ;;  %p22_p3 = scmp.ge.s32.totalorder %s1781_s27, 4   ;;  %s2039_s15 = smov %s1676_s16 }
 0x2de   : > { %s2040_s16 = smov %s1680_s17  ;;  %s2041_s17 = smov %s1798_s9 }
 0x2df   : > { %s2042_s18 = smov %s1781_s27  ;;  %24 = sbr.rel (!%p22_p3) target bundleno = 8 (0x8), region = 98 }
 0x2e4   :  { %1333 = vsyncpa [#allocation3], 1 }
 0x2e5   :  { %1335 = vsyncpa [#allocation3 + $0x1], 1 }
 0x2e6   :  { %1336 = vsyncpa [#allocation6], 1 }
 0x2e7   :  { %1337 = vsyncpa [#allocation4], 1 }
 0x2e8   :  { %1339 = vsyncpa [#allocation4 + $0x1], 1 }
 0x2e9   :  { %1340 = vsyncpa [#allocation9], 1 }
 0x2ea   :  { %1342 = vsyncpa [#allocation9 + $0x1], 1 }

</bundles_post_ra>
